<compile_context>
chip_gen: v7x
topology: tpu7x:2x2x1
jax: 0.10.0
libtpu: 0.0.40
codegen_flags: <defaults>
</compile_context>

<pallas_src>
import jax
import jax.numpy as jnp
from jax.experimental import pallas as pl
from jax.experimental.pallas import tpu as pltpu

DECAY = 1.0
THRESH_MIN = 8.0 / 128.0

_MAX_TILE_ELEMS = 1 << 20          # 1M elems (~4 MiB f32 per stream per step)
_MIN_TILE_ELEMS = 64 * 1024
_FALLBACK_VMEM_BUDGET = 32 << 20   # safe on every generation


def _lif_kernel(thr_ref, x_ref, mem_ref, spike_ref, new_mem_ref):
    # threshold lives in SMEM; clamp to the module's minimum inside the kernel
    thr = jnp.maximum(thr_ref[0], THRESH_MIN)

    # cast after the load (free VPU op) so non-f32 inputs stream fewer bytes
    x = x_ref[...].astype(jnp.float32)
    mem = DECAY * mem_ref[...].astype(jnp.float32) + x

    # ActFun.forward applied to 0.4*tanh(mem - thr): sign test only, so this is
    # exactly (mem >= thr) -- no EUP transcendental needed.
    spike_bool = mem >= thr
    spike_ref[...] = spike_bool.astype(spike_ref.dtype)

    # reset=True branch (mem *= 1 - spike) then zero out negative membrane:
    # select + max on the VPU instead of two mask-multiplies.
    new_mem = jnp.maximum(jnp.where(spike_bool, 0.0, mem), 0.0)
    new_mem_ref[...] = new_mem.astype(new_mem_ref.dtype)


def _vmem_budget_bytes():
    """Generation-aware scoped-VMEM budget for 4 streams x 2 pipeline buffers."""
    try:
        cap = pltpu.get_tpu_info().vmem_capacity_bytes   # 64 MiB v7x, 128 MiB v5e/v6e
        return int(min((3 * cap) // 4, 64 << 20))
    except Exception:
        return _FALLBACK_VMEM_BUDGET


def _choose_layout(n):
    """Pick the widest lane-dense width that divides n (avoids any pad copy)."""
    for lanes in (4096, 2048, 1024, 512, 256, 128):
        if n % lanes == 0:
            return lanes, 0
    # rare fallback: pad the tail to the next multiple of 128 lanes
    return 128, (-n) % 128


def _choose_block_rows(rows, lanes, max_tile_elems):
    """Largest multiple-of-8 divisor of rows that fits the tile budget.

    Also guarantees >= 2 grid steps when possible so a 2-TensorCore chip
    (v7x) can shard the parallel axis across both cores.
    """
    target = max(8, max_tile_elems // lanes)

    def best_divisor(limit):
        t = min(limit, rows)
        t = (t // 8) * 8
        while t >= 8:
            if rows % t == 0:
                return t
            t -= 8
        return None

    if rows <= target:
        # whole array fits a single block; split it when cleanly possible
        if rows >= 16:
            d = best_divisor(rows // 2)
            if d is not None:
                return d
        return rows

    d = best_divisor(target)
    if d is not None:
        return d
    # rare: rows has no multiple-of-8 divisor <= target -> ragged last tile
    return (target // 8) * 8


def lif_neuron_forward(inputs, mem, threshold,
                       spike_dtype=jnp.bfloat16, mem_dtype=jnp.float32):
    """inputs, mem: same shape (any floating dtype). threshold: shape (1,).

    Returns (spike, new_mem) with inputs' shape. spike values are exactly
    0.0/1.0 (lossless in bfloat16); the membrane is carried in mem_dtype
    (float32 by default to match the PyTorch reference accumulation).
    """
    orig_shape = inputs.shape
    flat_x = inputs.reshape(-1)                       # keep native dtype
    flat_m = mem.astype(mem_dtype).reshape(-1)
    n = flat_x.shape[0]

    lanes, pad = _choose_layout(n)
    if pad:
        # Rare path (n not a multiple of 128). The pad + tail slice each cost
        # an extra HBM pass; acceptable because it never triggers for typical
        # NCHW activation sizes.
        flat_x = jnp.pad(flat_x, (0, pad))
        flat_m = jnp.pad(flat_m, (0, pad))
    rows = (n + pad) // lanes
    x2d = flat_x.reshape(rows, lanes)
    m2d = flat_m.reshape(rows, lanes)

    bytes_per_elem = (jnp.dtype(x2d.dtype).itemsize
                      + 2 * jnp.dtype(mem_dtype).itemsize
                      + jnp.dtype(spike_dtype).itemsize)
    budget = _vmem_budget_bytes()
    max_tile_elems = max(_MIN_TILE_ELEMS,
                         min(_MAX_TILE_ELEMS, budget // (2 * bytes_per_elem)))

    block_rows = _choose_block_rows(rows, lanes, max_tile_elems)
    grid = (pl.cdiv(rows, block_rows),)
    block = pl.BlockSpec((block_rows, lanes), lambda i: (i, 0))

    spike2d, new_mem2d = pl.pallas_call(
        _lif_kernel,
        out_shape=(
            jax.ShapeDtypeStruct((rows, lanes), spike_dtype),
            jax.ShapeDtypeStruct((rows, lanes), mem_dtype),
        ),
        grid=grid,
        in_specs=[
            pl.BlockSpec(memory_space=pltpu.SMEM),   # threshold scalar
            block,                                   # inputs tile
            block,                                   # mem tile
        ],
        out_specs=(block, block),
        # update the membrane state in place (mem input -> new_mem output)
        input_output_aliases={2: 1},
        compiler_params=pltpu.CompilerParams(
            dimension_semantics=("parallel",),
            vmem_limit_bytes=budget,
        ),
    )(threshold.astype(jnp.float32), x2d, m2d)

    if pad:
        spike = spike2d.reshape(-1)[:n].reshape(orig_shape)
        new_mem = new_mem2d.reshape(-1)[:n].reshape(orig_shape)
    else:
        spike = spike2d.reshape(orig_shape)
        new_mem = new_mem2d.reshape(orig_shape)
    return spike, new_mem


class LIFNeuronPallas:
    """Stateful wrapper mirroring the PyTorch module (decay=1, reset=True)."""

    def __init__(self, threshold=1.0, spike_dtype=jnp.bfloat16,
                 mem_dtype=jnp.float32):
        self.threshold = jnp.array([threshold], dtype=jnp.float32)
        self.spike_dtype = spike_dtype   # 0/1 are exact in bf16 (lossless)
        self.mem_dtype = mem_dtype       # keep f32 to match reference precision
        self.mem = None

    def __call__(self, inputs):
        if self.mem is None:
            self.mem = jnp.zeros(inputs.shape, dtype=self.mem_dtype)
        spike, self.mem = lif_neuron_forward(
            inputs, self.mem, self.threshold,
            spike_dtype=self.spike_dtype, mem_dtype=self.mem_dtype)
        return spike

    def reset_state(self):
        self.mem = None

    # TODO(synk): ActFun's surrogate-gradient backward (sigmoid derivative * 5)
    # is training-only and not implemented here (forward pass only).


def _reference(inputs, mem, threshold):
    thr = jnp.maximum(threshold[0], THRESH_MIN)
    mem = DECAY * mem + inputs
    spike = (0.4 * jnp.tanh(mem - thr) >= 0).astype(jnp.float32)
    mem = mem * (1.0 - spike)
    mem = mem * (1.0 - (mem < 0).astype(jnp.float32))
    return spike, mem


if __name__ == "__main__":
    key = jax.random.PRNGKey(0)
    # two timesteps of NCHW input (batch=2, channels=4, spatial=16x16)
    x1, x2 = jax.random.normal(key, (2, 2, 4, 16, 16), dtype=jnp.float32)

    neuron = LIFNeuronPallas(threshold=1.0)
    s1 = neuron(x1)
    s2 = neuron(x2)
    jax.block_until_ready((s1, s2, neuron.mem))

    # correctness check against pure-JAX reference over both timesteps
    thr = jnp.array([1.0], jnp.float32)
    r1, rm = _reference(x1, jnp.zeros_like(x1), thr)
    r2, rm = _reference(x2, rm, thr)

    assert jnp.allclose(s1.astype(jnp.float32), r1), "spike mismatch (t=1)"
    assert jnp.allclose(s2.astype(jnp.float32), r2), "spike mismatch (t=2)"
    assert jnp.allclose(neuron.mem, rm, atol=1e-6), "mem mismatch"

    print("KERNEL_OK")
</pallas_src>

<mosaic_0001>
module attributes {stable_mosaic.version = 11 : i64} {
  func.func @_lif_kernel(%arg0: i32, %arg1: memref<1xf32, #tpu.memory_space<smem>>, %arg2: memref<1x2048xf32, #tpu.memory_space<vmem>>, %arg3: memref<1x2048xf32, #tpu.memory_space<vmem>>, %arg4: memref<1x2048xbf16, #tpu.memory_space<vmem>>, %arg5: memref<1x2048xf32, #tpu.memory_space<vmem>>) attributes {dimension_semantics = [#tpu.dimension_semantics<parallel>], iteration_bounds = array<i64: 1>, scalar_prefetch = 0 : i64, scratch_operands = 0 : i64, tpu.core_type = #tpu.core_type<tc>, window_params = [{transform_indices = @transform_0, window_bounds = array<i64: 1>}, {transform_indices = @transform_1, window_bounds = array<i64: 1, 2048>}, {transform_indices = @transform_2, window_bounds = array<i64: 1, 2048>}, {transform_indices = @transform_3, window_bounds = array<i64: 1, 2048>}, {transform_indices = @transform_4, window_bounds = array<i64: 1, 2048>}]} {
    %c0 = arith.constant 0 : index
    %0 = memref.load %arg1[%c0] : memref<1xf32, #tpu.memory_space<smem>>
    %cst = arith.constant 6.250000e-02 : f32
    %1 = arith.maximumf %0, %cst : f32
    %c0_0 = arith.constant 0 : index
    %c0_1 = arith.constant 0 : index
    %2 = vector.load %arg2[%c0_0, %c0_1] : memref<1x2048xf32, #tpu.memory_space<vmem>>, vector<1x2048xf32>
    %c0_2 = arith.constant 0 : index
    %c0_3 = arith.constant 0 : index
    %3 = vector.load %arg3[%c0_2, %c0_3] : memref<1x2048xf32, #tpu.memory_space<vmem>>, vector<1x2048xf32>
    %cst_4 = arith.constant 1.000000e+00 : f32
    %4 = vector.broadcast %cst_4 : f32 to vector<1x2048xf32>
    %5 = arith.mulf %4, %3 : vector<1x2048xf32>
    %6 = arith.addf %5, %2 : vector<1x2048xf32>
    %7 = vector.broadcast %1 : f32 to vector<1x2048xf32>
    %8 = arith.cmpf oge, %6, %7 : vector<1x2048xf32>
    %9 = arith.extui %8 : vector<1x2048xi1> to vector<1x2048xi32>
    %10 = arith.sitofp %9 : vector<1x2048xi32> to vector<1x2048xf32>
    %11 = arith.truncf %10 : vector<1x2048xf32> to vector<1x2048xbf16>
    %c0_5 = arith.constant 0 : index
    %c0_6 = arith.constant 0 : index
    %12 = vector.load %arg4[%c0_5, %c0_6] : memref<1x2048xbf16, #tpu.memory_space<vmem>>, vector<1x2048xbf16>
    tpu.vector_store %arg4[%c0_5, %c0_6], %11 {strides = array<i32>} : memref<1x2048xbf16, #tpu.memory_space<vmem>>, vector<1x2048xbf16>,
    %cst_7 = arith.constant 0.000000e+00 : f32
    %13 = vector.broadcast %cst_7 : f32 to vector<1x2048xf32>
    %14 = arith.select %8, %13, %6 : vector<1x2048xi1>, vector<1x2048xf32>
    %cst_8 = arith.constant 0.000000e+00 : f32
    %15 = vector.broadcast %cst_8 : f32 to vector<1x2048xf32>
    %16 = arith.maximumf %14, %15 : vector<1x2048xf32>
    %c0_9 = arith.constant 0 : index
    %c0_10 = arith.constant 0 : index
    %17 = vector.load %arg5[%c0_9, %c0_10] : memref<1x2048xf32, #tpu.memory_space<vmem>>, vector<1x2048xf32>
    tpu.vector_store %arg5[%c0_9, %c0_10], %16 {strides = array<i32>} : memref<1x2048xf32, #tpu.memory_space<vmem>>, vector<1x2048xf32>,
    return
  }
  func.func @transform_0(%arg0: i32) -> i32 {
    %c0_i32 = arith.constant 0 : i32
    %c0_i32_0 = arith.constant 0 : i32
    return %c0_i32 : i32
  }
  func.func @transform_1(%arg0: i32) -> (i32, i32) {
    %c0_i32 = arith.constant 0 : i32
    %c0_i32_0 = arith.constant 0 : i32
    return %arg0, %c0_i32 : i32, i32
  }
  func.func @transform_2(%arg0: i32) -> (i32, i32) {
    %c0_i32 = arith.constant 0 : i32
    %c0_i32_0 = arith.constant 0 : i32
    return %arg0, %c0_i32 : i32, i32
  }
  func.func @transform_3(%arg0: i32) -> (i32, i32) {
    %c0_i32 = arith.constant 0 : i32
    %c0_i32_0 = arith.constant 0 : i32
    return %arg0, %c0_i32 : i32, i32
  }
  func.func @transform_4(%arg0: i32) -> (i32, i32) {
    %c0_i32 = arith.constant 0 : i32
    %c0_i32_0 = arith.constant 0 : i32
    return %arg0, %c0_i32 : i32, i32
  }
}

</mosaic_0001>

<bundles_post_ra>
// kernel: tpu_custom_call.1
= control target key start
LH: loop header
LB: loop body
LE: loop exit
PB: predicated region body
PF: predicated region fallthrough
CT: control target
= control target key end

     0   :  { %11 = vsyncpa [#allocation4], 0  ;;  %s611_s0 = inlined_call_operand.<no memory space> [shape: f32[1], index: 0, kind: input, shape index: {}]   ;;  %s612_s1 = inlined_call_operand.vmem [shape: f32[1,2048], index: 1, kind: input, shape index: {}]   ;;  %s613_s2 = inlined_call_operand.hbm [shape: f32[1,2048], index: 2, kind: input, shape index: {}, may-alias: {2,4}]   ;;  %s614_s3 = inlined_call_operand.hbm [shape: bf16[1,2048], index: 3, kind: output, shape index: {0}]   ;;  %s615_s4 = inlined_call_operand.hbm [shape: f32[1,2048], index: 4, kind: output, shape index: {1}, may-alias: {2,4}]  }
   0x1   :  { %12 = vsyncpa [#allocation5], 0 }
   0x2   :  { %13 = vsyncpa [#allocation8], 0  ;;  %s420_s15 = smov [#allocation3]   ;;  %s348_s19 = scalar_lea.hbm %s613_s2, 256 }
   0x3   :  { %s24_s16 = sshll.u32 %s420_s15, 4  ;;  %p349_p0 = scmp.ne.s32.totalorder %s613_s2, %s348_s19  ;;  %s25_s16 = int_to_ptr.vmem [resolvable:$true] %s24_s16 }
   0x4   :  { %p352_p1 = scmp.lt.u32.totalorder %s348_s19, %s613_s2 }
   0x6   :  { %p354_p2 = pnand %p352_p1, %p349_p0 }
   0x8   :  { %357 = shalt.err (!%p354_p2)
}
   0x9   :  { %s358_s24 = scalar_lea.vmem %s25_s16, 256  ;;  %p363_p4 = scmp.lt.s32.totalorder %s25_s16, %s25_s16 }
   0xa   :  { %p359_p3 = scmp.ne.s32.totalorder %s25_s16, %s358_s24  ;;  %p364_p5 = scmp.lt.s32.totalorder %s358_s24, %s358_s24 }
   0xc   :  { %p365_p6 = por %p364_p5, %p363_p4 }
   0xe   :  { %p366_p7 = pnand %p365_p6, %p359_p3 }
  0x10   :  { %369 = shalt.err (!%p366_p7)
}
  0x11   :  { %27 = dma.hbm_to_vmem [thread:$0]  %s613_s2, 256, %s25_s16, [#allocation4]  }
  0x12   :  { %414 = dma.done.wait [#allocation4], 256  }
  0x13   :  { %415 = vsyncadd [#allocation4], 4294967040  ;;  %v48_v0 = vlaneseq  ;;  %v421_v1 = vmov 1966171168   ;;  %vm260_vm0 = vcmask 1040384   ;;  %vm263_vm2 = vcmask 1041409  }
  0x14   :  { %v165_v2 = vunpack.c.l.s4 %v421_v1  ;;  %vm261_vm1 = vsmask.f32 256  ;;  %vm264_vm4 = vsmask.f32 1280  ;;  %vm267_vm5 = vcmask 1042434   ;;  %s422_s27 = smov 0.0625  }
  0x15   :  { %vm463_vm3 = vmand %vm260_vm0, %vm261_vm1  ;;  %s470_s30 = smax.f32 %s422_s27, %s611_s0  ;;  %v472_v4 = vshrl.u32 %v48_v0, 7  ;;  %vm268_vm7 = vsmask.f32 2304  ;;  %vm271_vm9 = vcmask 1043459   ;;  %vm272_vm10 = vsmask.f32 3328 }
  0x16   :  { %vm265_vm6 = vmand %vm263_vm2, %vm264_vm4  ;;  %v166_v5 = vunpack.c.0.s8 %v165_v2  ;;  %v39_v6 = vstv %s470_s30  ;;  %vm275_vm13 = vcmask 1044484   ;;  %vm276_vm14 = vsmask.f32 4352  ;;  %v33_v8 = vld [vmem:[%s612_s1] sm:$0xff]  ;;  %v34_v17 = vld [vmem:[%s612_s1 + $0x8] sm:$0xff]  ;;  %s424_s1 = smov [#allocation7]  }
  0x17   :  { %vm266_vm8 = vmor %vm265_vm6, %vm463_vm3  ;;  %v35_v9 = vld [vmem:[#allocation3] sm:$0xff]  ;;  %v50_v10 = vsub.s32 0, %v472_v4  ;;  %v54_v11 = vsub.s32 1, %v472_v4  ;;  %v58_v12 = vsub.s32 2, %v472_v4  ;;  %v62_v13 = vsub.s32 3, %v472_v4  ;;  %v36_v22 = vld [vmem:[#allocation3 + $0x8] sm:$0xff] }
  0x18   :  { %vm269_vm11 = vmand %vm267_vm5, %vm268_vm7  ;;  %v37_v15 = vadd.f32 %v35_v9, %v33_v8  ;;  %v66_v16 = vsub.s32 4, %v472_v4  ;;  %vm279_vm1 = vcmask 1045509   ;;  %vm280_vm2 = vsmask.f32 5376  ;;  %s319_s7 = sshll.u32 %s424_s1, 4  ;;  %v291_v8 = vld [vmem:[#allocation6] sm:$0xff]  ;;  %s320_s7 = int_to_ptr.vmem [resolvable:$true] %s319_s7 }
  0x19   :  { %vm477_vm12 = vmor %vm269_vm11, %vm266_vm8  ;;  %v70_v18 = vsub.s32 5, %v472_v4  ;;  %v74_v19 = vsub.s32 6, %v472_v4  ;;  %v78_v20 = vsub.s32 7, %v472_v4  ;;  %v504_v21 = vsub.s32 %v166_v5, %v472_v4  ;;  %s370_s8 = scalar_lea.vmem %s320_s7, 256  ;;  %p375_p9 = scmp.lt.s32.totalorder %s320_s7, %s320_s7 }
  0x1a   :  { %vm488_vm15 = vmand %vm271_vm9, %vm272_vm10  ;;  %vm508_vm4 = vcmp.ge.f32.partialorder %v37_v15, %v39_v6  ;;  %vm283_vm6 = vcmask 1046534   ;;  %vm287_vm7 = vcmask 1047559   ;;  %v38_v25 = vadd.f32 %v36_v22, %v34_v17  ;;  %p371_p8 = scmp.ne.s32.totalorder %s320_s7, %s370_s8  ;;  %p376_p10 = scmp.lt.s32.totalorder %s370_s8, %s370_s8 }
  0x1b   :  { %vm274_vm0 = vmor %vm488_vm15, %vm477_vm12  ;;  %v423_v26 = vmov 0.0   ;;  %vm284_vm9 = vsmask.f32 6400  ;;  %vm288_vm10 = vsmask.f32 7424  ;;  %v297_v29 = vsel %vm508_vm4, 0.0, %v37_v15 }
  0x1c   :  { %vm277_vm3 = vmand %vm275_vm13, %vm276_vm14  ;;  %v332_v27 = vsel %vm508_vm4, 1.0, %v423_v26  ;;  %vm530_vm12 = vcmp.ge.f32.partialorder %v38_v25, %v39_v6  ;;  %v299_v41 = vmax.f32 %v297_v29, 0.0  ;;  %p377_p11 = por %p376_p10, %p375_p9 }
  0x1d   :  { %vm512_vm5 = vmor %vm277_vm3, %vm274_vm0  ;;  %v51_v30 = vrot.slane %v332_v27, %v50_v10  ;;  %v55_v31 = vrot.slane %v332_v27, %v54_v11  ;;  %v59_v32 = vrot.slane %v332_v27, %v58_v12  ;;  %v63_v33 = vrot.slane %v332_v27, %v62_v13 }
  0x1e   :  { %vm520_vm8 = vmand %vm279_vm1, %vm280_vm2  ;;  %v67_v34 = vrot.slane %v332_v27, %v66_v16  ;;  %v71_v35 = vrot.slane %v332_v27, %v70_v18  ;;  %v75_v36 = vrot.slane %v332_v27, %v74_v19  ;;  %v79_v37 = vrot.slane %v332_v27, %v78_v20  ;;  %301 = vst [vmem:[#allocation7] sm:$0xff] %v299_v41  ;;  %p378_p12 = pnand %p377_p11, %p371_p8 }
  0x1f   :  { %v334_v38 = vpack.c.bf16 %v55_v31, %v51_v30  ;;  %v335_v39 = vpack.c.bf16 %v63_v33, %v59_v32  ;;  %vm282_vm11 = vmor %vm520_vm8, %vm512_vm5  ;;  %v333_v45 = vsel %vm530_vm12, 1.0, %v423_v26  ;;  %v298_v46 = vsel %vm530_vm12, 0.0, %v38_v25 }
  0x20   :  { %v336_v42 = vpack.c.bf16 %v71_v35, %v67_v34  ;;  %v337_v43 = vpack.c.bf16 %v79_v37, %v75_v36  ;;  %vm536_vm13 = vmand %vm283_vm6, %vm284_vm9  ;;  %v83_v49 = vrot.slane %v333_v45, %v50_v10  ;;  %v87_v50 = vrot.slane %v333_v45, %v54_v11 }
  0x21   :  { %v170_v47 = vrot.slane %v334_v38, %v504_v21  ;;  %v177_v48 = vrot.slane %v335_v39, %v504_v21  ;;  %v91_v53 = vrot.slane %v333_v45, %v58_v12  ;;  %v95_v54 = vrot.slane %v333_v45, %v62_v13  ;;  %vm555_vm14 = vmor %vm536_vm13, %vm282_vm11 }
  0x22   :  { %v184_v51 = vrot.slane %v336_v42, %v504_v21  ;;  %v191_v52 = vrot.slane %v337_v43, %v504_v21  ;;  %v99_v57 = vrot.slane %v333_v45, %v66_v16  ;;  %v103_v58 = vrot.slane %v333_v45, %v70_v18  ;;  %vm561_vm15 = vmand %vm287_vm7, %vm288_vm10 }
  0x23   :  { %v192_v55 = vcombine.low %v170_v47, %v177_v48  ;;  %v107_v59 = vrot.slane %v333_v45, %v74_v19  ;;  %v111_v62 = vrot.slane %v333_v45, %v78_v20  ;;  %v338_v63 = vpack.c.bf16 %v87_v50, %v83_v49  ;;  %vm290_vm0 = vmor %vm561_vm15, %vm555_vm14 }
  0x24   :  { %v193_v60 = vcombine.low %v184_v51, %v191_v52  ;;  %v339_v0 = vpack.c.bf16 %v95_v54, %v91_v53  ;;  %v340_v2 = vpack.c.bf16 %v103_v58, %v99_v57  ;;  %v300_v3 = vmax.f32 %v298_v46, 0.0 }
  0x25   :  { %v200_v1 = vrot.slane %v192_v55, %v504_v21  ;;  %v341_v5 = vpack.c.bf16 %v111_v62, %v107_v59  ;;  %v219_v6 = vrot.slane %v338_v63, %v504_v21 }
  0x26   :  { %v207_v4 = vrot.slane %v193_v60, %v504_v21  ;;  %v226_v7 = vrot.slane %v339_v0, %v504_v21  ;;  %v233_v9 = vrot.slane %v340_v2, %v504_v21  ;;  %302 = vst [vmem:[#allocation7 + $0x8] sm:$0xff] %v300_v3 }
  0x27   :  { %v240_v11 = vrot.slane %v341_v5, %v504_v21 }
  0x28   :  { %v208_v10 = vcombine.low %v200_v1, %v207_v4  ;;  %v241_v12 = vcombine.low %v219_v6, %v226_v7 }
  0x29   :  { %381 = shalt.err (!%p378_p12)
}
  0x2a   :  { %s382_s11 = scalar_lea.hbm %s615_s4, 256 }
  0x2b   :  { %p383_p13 = scmp.ne.s32.totalorder %s615_s4, %s382_s11  ;;  %p386_p0 = scmp.lt.u32.totalorder %s382_s11, %s615_s4 }
  0x2d   :  { %p388_p1 = pnand %p386_p0, %p383_p13 }
  0x2f   :  { %391 = shalt.err (!%p388_p1)
}
  0x30   :  { %322 = dma.vmem_to_hbm [thread:$0]  %s320_s7, 256, %s615_s4, [#allocation8]   ;;  %v292_v13 = vsel %vm290_vm0, %v208_v10, %v291_v8  ;;  %v242_v14 = vcombine.low %v233_v9, %v240_v11  ;;  %v249_v15 = vrot.slane %v241_v12, %v504_v21  ;;  %v294_v17 = vld [vmem:[#allocation6 + $0x8] sm:$0xff] }
  0x31   :  { %293 = vst [vmem:[#allocation6] sm:$0xff] %v292_v13  ;;  %s425_s18 = smov [#allocation6]  }
  0x32   :  { %v256_v16 = vrot.slane %v242_v14, %v504_v21  ;;  %s309_s19 = sshll.u32 %s425_s18, 4  ;;  %s310_s19 = int_to_ptr.vmem [resolvable:$true] %s309_s19 }
  0x33   :  { %s392_s4 = scalar_lea.vmem %s310_s19, 256  ;;  %p397_p3 = scmp.lt.s32.totalorder %s310_s19, %s310_s19 }
  0x34   :  { %v257_v18 = vcombine.low %v249_v15, %v256_v16  ;;  %p393_p2 = scmp.ne.s32.totalorder %s310_s19, %s392_s4  ;;  %p398_p4 = scmp.lt.s32.totalorder %s392_s4, %s392_s4 }
  0x36   :  { %v295_v19 = vsel %vm290_vm0, %v257_v18, %v294_v17  ;;  %p399_p5 = por %p398_p4, %p397_p3 }
  0x37   :  { %296 = vst [vmem:[#allocation6 + $0x8] sm:$0xff] %v295_v19 }
  0x38   :  { %p400_p6 = pnand %p399_p5, %p393_p2 }
  0x3a   :  { %403 = shalt.err (!%p400_p6)
}
  0x3b   :  { %s404_s22 = scalar_lea.hbm %s614_s3, 256 }
  0x3c   :  { %p405_p7 = scmp.ne.s32.totalorder %s614_s3, %s404_s22  ;;  %p408_p8 = scmp.lt.u32.totalorder %s404_s22, %s614_s3 }
  0x3e   :  { %p410_p9 = pnand %p408_p8, %p405_p7 }
  0x40   :  { %413 = shalt.err (!%p410_p9)
}
  0x41   :  { %312 = dma.vmem_to_hbm [thread:$0]  %s310_s19, 256, %s614_s3, [#allocation5]  }
  0x42   :  { %416 = dma.done.wait [#allocation5], 256  }
  0x43   :  { %417 = vsyncadd [#allocation5], 4294967040 }
  0x44   :  { %418 = dma.done.wait [#allocation8], 256  }
  0x45   :  { %419 = vsyncadd [#allocation8], 4294967040 }
  0x46   :  { %329 = vsyncpa [#allocation4], 1 }
  0x47   :  { %330 = vsyncpa [#allocation5], 1 }
  0x48   :  { %331 = vsyncpa [#allocation8], 1 }

</bundles_post_ra>
